<compile_context>
chip_gen: v6e
topology: v6e:2x2x1
jax: 0.10.0
libtpu: 0.0.40
codegen_flags: <defaults>
</compile_context>

<pallas_src>
import jax
import jax.numpy as jnp
from jax.experimental import pallas as pl
from jax.experimental.pallas import tpu as pltpu


def model_kernel(x_ref,
                 w1_ref, b1_ref,
                 w2_ref, b2_ref,
                 w3_ref, b3_ref,
                 wff_ref, bff_ref,
                 wf2_ref, bf2_ref,
                 o_ref):
    """One batch tile: x_ref (TB, 30) f32 -> o_ref (1, 1, TB) f32."""
    mx = w1_ref.dtype                        # MXU input dtype (bf16 by default)

    # (TB, 30) -> (30, TB): in-kernel transpose (XLU) so the wrapper never
    # round-trips x through HBM just to change layout.
    xt = jnp.transpose(x_ref[...])           # (30, TB) f32

    def dense_relu(w_ref, b_ref, h):
        y = jnp.dot(w_ref[...], h.astype(mx),
                    preferred_element_type=jnp.float32) + b_ref[...]
        return jnp.maximum(y, 0.0)

    # Three Conv1d(kernel_size=2)+ReLU layers, each as ONE block-Toeplitz
    # matmul (MaxPool1d(kernel_size=1) is the identity and is elided).
    h = dense_relu(w1_ref, b1_ref, xt)       # (32, TB)  = 4 timesteps x  8 ch
    h = dense_relu(w2_ref, b2_ref, h)        # (48, TB)  = 3 timesteps x 16 ch
    h = dense_relu(w3_ref, b3_ref, h)        # (64, TB)  = 2 timesteps x 32 ch == flat

    # cnn_fc + fc1 fused wrapper-side (no nonlinearity between them).
    # TODO(synk): nn.Dropout(0.3) is identity in eval mode; training-mode mask
    # is not implemented.
    h = dense_relu(wff_ref, bff_ref, h)      # (128, TB)

    # fc2 (1x128): M=1 wastes 127/128 MXU rows -> VPU multiply + XLU sublane
    # reduction instead (both slots have slack here).
    out = jnp.sum(wf2_ref[...] * h, axis=0, keepdims=True) + bf2_ref[...]   # (1, TB)
    o_ref[0] = out                           # lane-dense (1, TB) store


def init_params(key):
    """Deterministic PyTorch-style uniform init (+-1/sqrt(fan_in))."""
    ks = jax.random.split(key, 12)

    def u(k, shape, fan_in):
        bound = 1.0 / float(fan_in) ** 0.5
        return jax.random.uniform(k, shape, jnp.float32, -bound, bound)

    return dict(
        w1=u(ks[0], (8, 6, 2), 12),    b1=u(ks[1], (8,), 12),
        w2=u(ks[2], (16, 8, 2), 16),   b2=u(ks[3], (16,), 16),
        w3=u(ks[4], (32, 16, 2), 32),  b3=u(ks[5], (32,), 32),
        wfc=u(ks[6], (128, 64), 64),   bfc=u(ks[7], (128,), 64),
        wf1=u(ks[8], (128, 128), 128), bf1=u(ks[9], (128,), 128),
        wf2=u(ks[10], (1, 128), 128),  bf2=u(ks[11], (1,), 128),
    )


def _round_up(n, m):
    return ((n + m - 1) // m) * m


def _toeplitz(w, l_in):
    """Conv1d(kernel_size=2, stride=1, no pad) weight (Cout,Cin,2) -> block-
    Toeplitz matrix mapping a time-major flattened input (l_in*Cin) to a
    time-major flattened output ((l_in-1)*Cout)."""
    c_out, c_in, k = w.shape
    assert k == 2
    l_out = l_in - 1
    taps = jnp.concatenate([w[:, :, 0], w[:, :, 1]], axis=1)      # (Cout, 2*Cin)
    big = jnp.zeros((l_out * c_out, l_in * c_in), jnp.float32)
    for t in range(l_out):
        big = big.at[t * c_out:(t + 1) * c_out,
                     t * c_in:(t + 2) * c_in].set(taps)
    return big


def _prepare_weights(p, mxu_dtype):
    """Fold the network's static algebra into a handful of small matrices."""
    w1 = _toeplitz(p["w1"], 5)                                    # (32, 30)
    w2 = _toeplitz(p["w2"], 4)                                    # (48, 32)
    w3 = _toeplitz(p["w3"], 3)                                    # (64, 48)
    b1 = jnp.tile(p["b1"], 4).reshape(32, 1)
    b2 = jnp.tile(p["b2"], 3).reshape(48, 1)
    b3 = jnp.tile(p["b3"], 2).reshape(64, 1)

    # cnn_fc columns permuted from PyTorch's channel-major .view() order
    # (j = c*2 + t) to the kernel's time-major flatten order (j' = t*32 + c).
    wfc_k = jnp.transpose(p["wfc"].reshape(128, 32, 2), (0, 2, 1)).reshape(128, 64)

    # Fuse cnn_fc + fc1: relu(wf1 @ (wfc@f + bfc) + bf1)
    #                  == relu((wf1@wfc) @ f + (wf1@bfc + bf1)).
    wff = p["wf1"] @ wfc_k                                        # (128, 64)
    bff = (p["wf1"] @ p["bfc"] + p["bf1"]).reshape(128, 1)

    wf2_col = p["wf2"].reshape(128, 1)                            # fc2 as a column
    bf2 = p["bf2"].reshape(1, 1)

    mx = mxu_dtype
    return [
        w1.astype(mx), b1,
        w2.astype(mx), b2,
        w3.astype(mx), b3,
        wff.astype(mx), bff,
        wf2_col, bf2,
    ]


def forward_pallas(x, p, *, block_b=2048, mxu_dtype=jnp.bfloat16):
    """x: (B, 5, 6) float32 -> (B, 1) float32 (matches PyTorch forward, eval)."""
    B, L, C = x.shape
    assert (L, C) == (5, 6), "cnn_fc(in_features=64) forces L=5, C=6"
    F = L * C                                   # 30 features, time-major order

    # Batch tile (lane dim): multiple of 128.  Prefer >= 2 grid steps when the
    # batch allows it so the "parallel" axis can shard across v7x's two TCs.
    full = _round_up(B, 128)
    cap = full if full <= 128 else _round_up((full + 1) // 2, 128)
    TB = max(128, min(block_b, cap))
    Bp = _round_up(B, TB)
    nt = Bp // TB

    # x stays batch-major: (B,5,6) -> (B,30) is a free reshape; only the batch
    # is padded.  The (features, batch) transpose happens per tile in-kernel.
    x2 = x.reshape(B, F)
    if Bp != B:
        x2 = jnp.pad(x2, ((0, Bp - B), (0, 0)))

    weights = _prepare_weights(p, mxu_dtype)

    # x: one (TB, 30) block per grid step; weights/biases: full arrays with
    # constant index_maps so they stay VMEM-resident across the whole grid.
    in_specs = [pl.BlockSpec((TB, F), lambda i: (i, 0))]
    for a in weights:
        in_specs.append(pl.BlockSpec(a.shape, lambda i: (0, 0)))

    out = pl.pallas_call(
        model_kernel,
        out_shape=jax.ShapeDtypeStruct((nt, 1, TB), jnp.float32),
        grid=(nt,),
        in_specs=in_specs,
        out_specs=pl.BlockSpec((1, 1, TB), lambda i: (i, 0, 0)),
        compiler_params=pltpu.CompilerParams(
            dimension_semantics=("parallel",)),
    )(x2, *weights)

    return out.reshape(Bp)[:B].reshape(B, 1)


def forward_ref(x, p):
    """Pure-JAX f32 replica of the PyTorch forward (eval mode), NCL conv layout."""
    h = jnp.transpose(x, (0, 2, 1))                               # (B, 6, 5)

    def conv(h, w, b):
        L = h.shape[-1]
        y = (jnp.einsum("bcl,oc->bol", h[:, :, : L - 1], w[:, :, 0])
             + jnp.einsum("bcl,oc->bol", h[:, :, 1:], w[:, :, 1])
             + b[None, :, None])
        return jax.nn.relu(y)

    h = conv(h, p["w1"], p["b1"])
    h = conv(h, p["w2"], p["b2"])
    h = conv(h, p["w3"], p["b3"])
    flat = h.reshape(h.shape[0], -1)                              # channel-major .view
    z = flat @ p["wfc"].T + p["bfc"]
    hh = jax.nn.relu(z @ p["wf1"].T + p["bf1"])
    return hh @ p["wf2"].T + p["bf2"]


if __name__ == "__main__":
    key = jax.random.PRNGKey(0)
    k_x, k_x2, k_p = jax.random.split(key, 3)
    params = init_params(k_p)

    # Case 1: small batch, single tile (L=5 is forced by cnn_fc's in_features=64).
    B = 4
    x = jax.random.normal(k_x, (B, 5, 6), dtype=jnp.float32)
    out = jax.block_until_ready(forward_pallas(x, params))
    ref = forward_ref(x, params)
    assert out.shape == (B, 1), out.shape
    assert jnp.allclose(out, ref, rtol=2e-2, atol=2e-2), (out, ref)

    # Case 2: multi-tile batch, not a multiple of 128 (exercises padding and
    # the nt > 1 / parallel-grid path).
    B2 = 700
    x_big = jax.random.normal(k_x2, (B2, 5, 6), dtype=jnp.float32)
    out2 = jax.block_until_ready(forward_pallas(x_big, params, block_b=256))
    ref2 = forward_ref(x_big, params)
    assert out2.shape == (B2, 1), out2.shape
    assert jnp.allclose(out2, ref2, rtol=2e-2, atol=2e-2)

    print("KERNEL_OK")
</pallas_src>

<mosaic_0001>
module attributes {stable_mosaic.version = 11 : i64} {
  func.func @model_kernel(%arg0: i32, %arg1: memref<128x30xf32, #tpu.memory_space<vmem>>, %arg2: memref<32x30xbf16, #tpu.memory_space<vmem>>, %arg3: memref<32x1xf32, #tpu.memory_space<vmem>>, %arg4: memref<48x32xbf16, #tpu.memory_space<vmem>>, %arg5: memref<48x1xf32, #tpu.memory_space<vmem>>, %arg6: memref<64x48xbf16, #tpu.memory_space<vmem>>, %arg7: memref<64x1xf32, #tpu.memory_space<vmem>>, %arg8: memref<128x64xbf16, #tpu.memory_space<vmem>>, %arg9: memref<128x1xf32, #tpu.memory_space<vmem>>, %arg10: memref<128x1xf32, #tpu.memory_space<vmem>>, %arg11: memref<1x1xf32, #tpu.memory_space<vmem>>, %arg12: memref<1x1x128xf32, #tpu.memory_space<vmem>>) attributes {dimension_semantics = [#tpu.dimension_semantics<parallel>], iteration_bounds = array<i64: 1>, scalar_prefetch = 0 : i64, scratch_operands = 0 : i64, tpu.core_type = #tpu.core_type<tc>, window_params = [{transform_indices = @transform_0, window_bounds = array<i64: 128, 30>}, {pipeline_mode = #tpu.pipeline_mode<synchronous>, transform_indices = @transform_1, window_bounds = array<i64: 32, 30>}, {pipeline_mode = #tpu.pipeline_mode<synchronous>, transform_indices = @transform_2, window_bounds = array<i64: 32, 1>}, {pipeline_mode = #tpu.pipeline_mode<synchronous>, transform_indices = @transform_3, window_bounds = array<i64: 48, 32>}, {pipeline_mode = #tpu.pipeline_mode<synchronous>, transform_indices = @transform_4, window_bounds = array<i64: 48, 1>}, {pipeline_mode = #tpu.pipeline_mode<synchronous>, transform_indices = @transform_5, window_bounds = array<i64: 64, 48>}, {pipeline_mode = #tpu.pipeline_mode<synchronous>, transform_indices = @transform_6, window_bounds = array<i64: 64, 1>}, {pipeline_mode = #tpu.pipeline_mode<synchronous>, transform_indices = @transform_7, window_bounds = array<i64: 128, 64>}, {pipeline_mode = #tpu.pipeline_mode<synchronous>, transform_indices = @transform_8, window_bounds = array<i64: 128, 1>}, {pipeline_mode = #tpu.pipeline_mode<synchronous>, transform_indices = @transform_9, window_bounds = array<i64: 128, 1>}, {pipeline_mode = #tpu.pipeline_mode<synchronous>, transform_indices = @transform_10, window_bounds = array<i64: 1, 1>}, {transform_indices = @transform_11, window_bounds = array<i64: 1, 1, 128>}]} {
    %c0 = arith.constant 0 : index
    %c0_0 = arith.constant 0 : index
    %0 = vector.load %arg1[%c0, %c0_0] : memref<128x30xf32, #tpu.memory_space<vmem>>, vector<128x30xf32>
    %1 = tpu.transpose %0, [1, 0] : vector<128x30xf32> -> vector<30x128xf32>
    %c0_1 = arith.constant 0 : index
    %c0_2 = arith.constant 0 : index
    %2 = vector.load %arg2[%c0_1, %c0_2] : memref<32x30xbf16, #tpu.memory_space<vmem>>, vector<32x30xbf16>
    %3 = arith.truncf %1 : vector<30x128xf32> to vector<30x128xbf16>
    %cst = arith.constant dense<0.000000e+00> : vector<32x128xf32>
    %4 = tpu.matmul %2, %3, %cst {dimension_numbers = #tpu.dot_dimension_numbers<[1], [0], [0], [1], [0, 0, 1, 1], [], []>} : vector<32x30xbf16>, vector<30x128xbf16>, vector<32x128xf32> -> vector<32x128xf32>
    %c0_3 = arith.constant 0 : index
    %c0_4 = arith.constant 0 : index
    %5 = vector.load %arg3[%c0_3, %c0_4] : memref<32x1xf32, #tpu.memory_space<vmem>>, vector<32x1xf32>
    %6 = vector.broadcast %5 : vector<32x1xf32> to vector<32x128xf32>
    %7 = arith.addf %4, %6 : vector<32x128xf32>
    %cst_5 = arith.constant 0.000000e+00 : f32
    %8 = vector.broadcast %cst_5 : f32 to vector<32x128xf32>
    %9 = arith.maximumf %7, %8 : vector<32x128xf32>
    %c0_6 = arith.constant 0 : index
    %c0_7 = arith.constant 0 : index
    %10 = vector.load %arg4[%c0_6, %c0_7] : memref<48x32xbf16, #tpu.memory_space<vmem>>, vector<48x32xbf16>
    %11 = arith.truncf %9 : vector<32x128xf32> to vector<32x128xbf16>
    %cst_8 = arith.constant dense<0.000000e+00> : vector<48x128xf32>
    %12 = tpu.matmul %10, %11, %cst_8 {dimension_numbers = #tpu.dot_dimension_numbers<[1], [0], [0], [1], [0, 0, 1, 1], [], []>} : vector<48x32xbf16>, vector<32x128xbf16>, vector<48x128xf32> -> vector<48x128xf32>
    %c0_9 = arith.constant 0 : index
    %c0_10 = arith.constant 0 : index
    %13 = vector.load %arg5[%c0_9, %c0_10] : memref<48x1xf32, #tpu.memory_space<vmem>>, vector<48x1xf32>
    %14 = vector.broadcast %13 : vector<48x1xf32> to vector<48x128xf32>
    %15 = arith.addf %12, %14 : vector<48x128xf32>
    %cst_11 = arith.constant 0.000000e+00 : f32
    %16 = vector.broadcast %cst_11 : f32 to vector<48x128xf32>
    %17 = arith.maximumf %15, %16 : vector<48x128xf32>
    %c0_12 = arith.constant 0 : index
    %c0_13 = arith.constant 0 : index
    %18 = vector.load %arg6[%c0_12, %c0_13] : memref<64x48xbf16, #tpu.memory_space<vmem>>, vector<64x48xbf16>
    %19 = arith.truncf %17 : vector<48x128xf32> to vector<48x128xbf16>
    %cst_14 = arith.constant dense<0.000000e+00> : vector<64x128xf32>
    %20 = tpu.matmul %18, %19, %cst_14 {dimension_numbers = #tpu.dot_dimension_numbers<[1], [0], [0], [1], [0, 0, 1, 1], [], []>} : vector<64x48xbf16>, vector<48x128xbf16>, vector<64x128xf32> -> vector<64x128xf32>
    %c0_15 = arith.constant 0 : index
    %c0_16 = arith.constant 0 : index
    %21 = vector.load %arg7[%c0_15, %c0_16] : memref<64x1xf32, #tpu.memory_space<vmem>>, vector<64x1xf32>
    %22 = vector.broadcast %21 : vector<64x1xf32> to vector<64x128xf32>
    %23 = arith.addf %20, %22 : vector<64x128xf32>
    %cst_17 = arith.constant 0.000000e+00 : f32
    %24 = vector.broadcast %cst_17 : f32 to vector<64x128xf32>
    %25 = arith.maximumf %23, %24 : vector<64x128xf32>
    %c0_18 = arith.constant 0 : index
    %c0_19 = arith.constant 0 : index
    %26 = vector.load %arg8[%c0_18, %c0_19] : memref<128x64xbf16, #tpu.memory_space<vmem>>, vector<128x64xbf16>
    %27 = arith.truncf %25 : vector<64x128xf32> to vector<64x128xbf16>
    %cst_20 = arith.constant dense<0.000000e+00> : vector<128x128xf32>
    %28 = tpu.matmul %26, %27, %cst_20 {dimension_numbers = #tpu.dot_dimension_numbers<[1], [0], [0], [1], [0, 0, 1, 1], [], []>} : vector<128x64xbf16>, vector<64x128xbf16>, vector<128x128xf32> -> vector<128x128xf32>
    %c0_21 = arith.constant 0 : index
    %c0_22 = arith.constant 0 : index
    %29 = vector.load %arg9[%c0_21, %c0_22] : memref<128x1xf32, #tpu.memory_space<vmem>>, vector<128x1xf32>
    %30 = vector.broadcast %29 : vector<128x1xf32> to vector<128x128xf32>
    %31 = arith.addf %28, %30 : vector<128x128xf32>
    %cst_23 = arith.constant 0.000000e+00 : f32
    %32 = vector.broadcast %cst_23 : f32 to vector<128x128xf32>
    %33 = arith.maximumf %31, %32 : vector<128x128xf32>
    %c0_24 = arith.constant 0 : index
    %c0_25 = arith.constant 0 : index
    %34 = vector.load %arg10[%c0_24, %c0_25] : memref<128x1xf32, #tpu.memory_space<vmem>>, vector<128x1xf32>
    %35 = vector.broadcast %34 : vector<128x1xf32> to vector<128x128xf32>
    %36 = arith.mulf %35, %33 : vector<128x128xf32>
    %cst_26 = arith.constant dense<0.000000e+00> : vector<128xf32>
    %37 = vector.multi_reduction <add>, %36, %cst_26 [0] : vector<128x128xf32> to vector<128xf32>
    %38 = vector.shape_cast %37 : vector<128xf32> to vector<1x128xf32>
    %c0_27 = arith.constant 0 : index
    %c0_28 = arith.constant 0 : index
    %39 = vector.load %arg11[%c0_27, %c0_28] : memref<1x1xf32, #tpu.memory_space<vmem>>, vector<1x1xf32>
    %40 = vector.broadcast %39 : vector<1x1xf32> to vector<1x128xf32>
    %41 = arith.addf %38, %40 : vector<1x128xf32>
    %c0_29 = arith.constant 0 : index
    %c0_30 = arith.constant 0 : index
    %c0_31 = arith.constant 0 : index
    %42 = vector.load %arg12[%c0_29, %c0_30, %c0_31] : memref<1x1x128xf32, #tpu.memory_space<vmem>>, vector<1x1x128xf32>
    %43 = vector.shape_cast %42 : vector<1x1x128xf32> to vector<1x128xf32>
    %44 = vector.shape_cast %41 : vector<1x128xf32> to vector<1x1x128xf32>
    tpu.vector_store %arg12[%c0_29, %c0_30, %c0_31], %44 {strides = array<i32>} : memref<1x1x128xf32, #tpu.memory_space<vmem>>, vector<1x1x128xf32>,
    return
  }
  func.func @transform_0(%arg0: i32) -> (i32, i32) {
    %c0_i32 = arith.constant 0 : i32
    %c0_i32_0 = arith.constant 0 : i32
    return %arg0, %c0_i32 : i32, i32
  }
  func.func @transform_1(%arg0: i32) -> (i32, i32) {
    %c0_i32 = arith.constant 0 : i32
    %c0_i32_0 = arith.constant 0 : i32
    %c0_i32_1 = arith.constant 0 : i32
    return %c0_i32, %c0_i32_0 : i32, i32
  }
  func.func @transform_2(%arg0: i32) -> (i32, i32) {
    %c0_i32 = arith.constant 0 : i32
    %c0_i32_0 = arith.constant 0 : i32
    %c0_i32_1 = arith.constant 0 : i32
    return %c0_i32, %c0_i32_0 : i32, i32
  }
  func.func @transform_3(%arg0: i32) -> (i32, i32) {
    %c0_i32 = arith.constant 0 : i32
    %c0_i32_0 = arith.constant 0 : i32
    %c0_i32_1 = arith.constant 0 : i32
    return %c0_i32, %c0_i32_0 : i32, i32
  }
  func.func @transform_4(%arg0: i32) -> (i32, i32) {
    %c0_i32 = arith.constant 0 : i32
    %c0_i32_0 = arith.constant 0 : i32
    %c0_i32_1 = arith.constant 0 : i32
    return %c0_i32, %c0_i32_0 : i32, i32
  }
  func.func @transform_5(%arg0: i32) -> (i32, i32) {
    %c0_i32 = arith.constant 0 : i32
    %c0_i32_0 = arith.constant 0 : i32
    %c0_i32_1 = arith.constant 0 : i32
    return %c0_i32, %c0_i32_0 : i32, i32
  }
  func.func @transform_6(%arg0: i32) -> (i32, i32) {
    %c0_i32 = arith.constant 0 : i32
    %c0_i32_0 = arith.constant 0 : i32
    %c0_i32_1 = arith.constant 0 : i32
    return %c0_i32, %c0_i32_0 : i32, i32
  }
  func.func @transform_7(%arg0: i32) -> (i32, i32) {
    %c0_i32 = arith.constant 0 : i32
    %c0_i32_0 = arith.constant 0 : i32
    %c0_i32_1 = arith.constant 0 : i32
    return %c0_i32, %c0_i32_0 : i32, i32
  }
  func.func @transform_8(%arg0: i32) -> (i32, i32) {
    %c0_i32 = arith.constant 0 : i32
    %c0_i32_0 = arith.constant 0 : i32
    %c0_i32_1 = arith.constant 0 : i32
    return %c0_i32, %c0_i32_0 : i32, i32
  }
  func.func @transform_9(%arg0: i32) -> (i32, i32) {
    %c0_i32 = arith.constant 0 : i32
    %c0_i32_0 = arith.constant 0 : i32
    %c0_i32_1 = arith.constant 0 : i32
    return %c0_i32, %c0_i32_0 : i32, i32
  }
  func.func @transform_10(%arg0: i32) -> (i32, i32) {
    %c0_i32 = arith.constant 0 : i32
    %c0_i32_0 = arith.constant 0 : i32
    %c0_i32_1 = arith.constant 0 : i32
    return %c0_i32, %c0_i32_0 : i32, i32
  }
  func.func @transform_11(%arg0: i32) -> (i32, i32, i32) {
    %c0_i32 = arith.constant 0 : i32
    %c0_i32_0 = arith.constant 0 : i32
    %c0_i32_1 = arith.constant 0 : i32
    return %arg0, %c0_i32, %c0_i32_0 : i32, i32, i32
  }
}

</mosaic_0001>

<bundles_post_ra>
// kernel: tpu_custom_call.1
= control target key start
LH: loop header
LB: loop body
LE: loop exit
PB: predicated region body
PF: predicated region fallthrough
CT: control target
= control target key end

     0   :  { %s1452_s0 = inlined_call_operand.vmem [shape: f32[128,30], index: 0, kind: input, shape index: {}]   ;;  %s1453_s1 = inlined_call_operand.vmem [shape: bf16[32,30], index: 1, kind: input, shape index: {}]   ;;  %s1454_s2 = inlined_call_operand.vmem [shape: f32[32,1], index: 2, kind: input, shape index: {}]   ;;  %s1455_s3 = inlined_call_operand.vmem [shape: bf16[48,32], index: 3, kind: input, shape index: {}]   ;;  %s1456_s4 = inlined_call_operand.vmem [shape: f32[48,1], index: 4, kind: input, shape index: {}]   ;;  %s1457_s5 = inlined_call_operand.vmem [shape: bf16[64,48], index: 5, kind: input, shape index: {}]   ;;  %s1458_s6 = inlined_call_operand.vmem [shape: f32[64,1], index: 6, kind: input, shape index: {}]   ;;  %s1459_s7 = inlined_call_operand.vmem [shape: bf16[128,64], index: 7, kind: input, shape index: {}]   ;;  %s1460_s8 = inlined_call_operand.vmem [shape: f32[128,1], index: 8, kind: input, shape index: {}]   ;;  %s1461_s9 = inlined_call_operand.vmem [shape: f32[128,1], index: 9, kind: input, shape index: {}]   ;;  %s1462_s10 = inlined_call_operand.<no memory space> [shape: f32[1,1], index: 10, kind: input, shape index: {}]   ;;  %s1463_s11 = inlined_call_operand.hbm [shape: f32[1,1,128], index: 11, kind: output, shape index: {}]  }
   0x1   :  { %v16_v0 = vstv %s1462_s10 }
   0x2   :  { %17 = vst [vmem:[#allocation2] sm:$0x1] %v16_v0 }
   0x3   :  { %v42_v1 = vld [vmem:[%s1452_s0] sm:$0xff]  ;;  %v1114_v2 = vmov 0   ;;  %v43_v3 = vld [vmem:[%s1452_s0 + $0x8] sm:$0xff]  ;;  %v98_v4 = vld [vmem:[%s1454_s2 + $0x10] sm:$0xff]  ;;  %vm130_vm0 = vcmask 244736  }
   0x4   :  { %58 = vxpose.xlu0.b32.start [1/16] (narrow) %v42_v1, 32  ;;  %1073 = vset.pattern.permute.xlu1 %v1114_v2  ;;  %v44_v5 = vld [vmem:[%s1452_s0 + $0x10] sm:$0xff]  ;;  %v99_v6 = vld [vmem:[%s1454_s2 + $0x18] sm:$0xff]  ;;  %v96_v8 = vld [vmem:[%s1454_s2] sm:$0xff] }
   0x5   :  { %112 = vperm.xlu1 %1073, %v98_v4   ;;  %v45_v7 = vld [vmem:[%s1452_s0 + $0x18] sm:$0xff]  ;;  %v46_v9 = vld [vmem:[%s1452_s0 + $0x20] sm:$0xff]  ;;  %v97_v10 = vld [vmem:[%s1454_s2 + $0x8] sm:$0xff] }
   0x6   :  { %v47_v11 = vld [vmem:[%s1452_s0 + $0x28] sm:$0xff]  ;;  %v206_v12 = vld [vmem:[%s1456_s4 + $0x20] sm:$0xff]  ;;  %v48_v14 = vld [vmem:[%s1452_s0 + $0x30] sm:$0xff] }
   0x7   :  { %v1075_v13 = vld [vmem:[%s1453_s1] sm:$0xff]   ;;  %v207_v15 = vld [vmem:[%s1456_s4 + $0x28] sm:$0xff]  ;;  %v49_v16 = vld [vmem:[%s1452_s0 + $0x38] sm:$0xff] }
   0x8   :  { %59 = vxpose.xlu0.b32.cont [2/16] (narrow) %v43_v3, 32  ;;  %1010 = vmatprep.mubr.msk.bf16.mxu0 %vm130_vm0, %v1075_v13  ;;  %v204_v17 = vld [vmem:[%s1456_s4 + $0x10] sm:$0xff]  ;;  %v50_v18 = vld [vmem:[%s1452_s0 + $0x40] sm:$0xff] }
   0x9   :  { %117 = vperm.xlu1 %1073, %v99_v6  }
   0xc   :  { %60 = vxpose.xlu0.b32.cont [3/16] (narrow) %v44_v5, 32 }
   0xd   :  { %102 = vperm.xlu1 %1073, %v96_v8  }
  0x10   :  { %61 = vxpose.xlu0.b32.cont [4/16] (narrow) %v45_v7, 32 }
  0x11   :  { %107 = vperm.xlu1 %1073, %v97_v10  }
  0x14   :  { %62 = vxpose.xlu0.b32.cont [5/16] (narrow) %v46_v9, 32 }
  0x15   :  { %230 = vperm.xlu1 %1073, %v206_v12  }
  0x18   :  { %63 = vxpose.xlu0.b32.cont [6/16] (narrow) %v47_v11, 32 }
  0x19   :  { %235 = vperm.xlu1 %1073, %v207_v15  }
  0x1c   :  { %64 = vxpose.xlu0.b32.cont [7/16] (narrow) %v48_v14, 32 }
  0x1d   :  { %220 = vperm.xlu1 %1073, %v204_v17  }
  0x20   :  { %65 = vxpose.xlu0.b32.cont [8/16] (narrow) %v49_v16, 32 }
  0x21   :  { %18 = vsyncpa [#allocation4], 0  ;;  %v205_v19 = vld [vmem:[%s1456_s4 + $0x18] sm:$0xff]  ;;  %v51_v20 = vld [vmem:[%s1452_s0 + $0x48] sm:$0xff]  ;;  %vm137_vm1 = vcmask 1046528   ;;  %v1115_v1 = vmov 0.0  }
  0x22   :  { %225 = vperm.xlu1 %1073, %v205_v19   ;;  %v202_v21 = vld [vmem:[%s1456_s4] sm:$0xff]  ;;  %v52_v22 = vld [vmem:[%s1452_s0 + $0x50] sm:$0xff]  ;;  %v203_v23 = vld [vmem:[%s1456_s4 + $0x8] sm:$0xff]  ;;  %vm1116_vm2 = vmmov 0   ;;  %vm253_vm3 = vcmask 261120   ;;  %vm405_vm4 = vcmask 392192  }
  0x23   :  { %v53_v24 = vld [vmem:[%s1452_s0 + $0x58] sm:$0xff]  ;;  %v343_v25 = vld [vmem:[%s1458_s6 + $0x30] sm:$0xff]  ;;  %v54_v26 = vld [vmem:[%s1452_s0 + $0x60] sm:$0xff]  ;;  %vm647_vm5 = vcmask 523264  }
  0x24   :  { %66 = vxpose.xlu0.b32.cont [9/16] (narrow) %v50_v18, 32  ;;  %v344_v27 = vld [vmem:[%s1458_s6 + $0x38] sm:$0xff]  ;;  %v55_v28 = vld [vmem:[%s1452_s0 + $0x68] sm:$0xff]  ;;  %v341_v29 = vld [vmem:[%s1458_s6 + $0x20] sm:$0xff] }
  0x25   :  { %v56_v30 = vld [vmem:[%s1452_s0 + $0x70] sm:$0xff]  ;;  %v342_v31 = vld [vmem:[%s1458_s6 + $0x28] sm:$0xff]  ;;  %v57_v32 = vld [vmem:[%s1452_s0 + $0x78] sm:$0xff] }
  0x26   :  { %210 = vperm.xlu1 %1073, %v202_v21   ;;  %v339_v33 = vld [vmem:[%s1458_s6 + $0x10] sm:$0xff]  ;;  %v340_v34 = vld [vmem:[%s1458_s6 + $0x18] sm:$0xff]  ;;  %v338_v35 = vld [vmem:[%s1458_s6 + $0x8] sm:$0xff] }
  0x27   :  { %v511_v36 = vld [vmem:[%s1460_s8] sm:$0xff]  ;;  %v512_v37 = vld [vmem:[%s1460_s8 + $0x8] sm:$0xff]  ;;  %v513_v38 = vld [vmem:[%s1460_s8 + $0x10] sm:$0xff] }
  0x28   :  { %67 = vxpose.xlu0.b32.cont [10/16] (narrow) %v51_v20, 32  ;;  %v514_v39 = vld [vmem:[%s1460_s8 + $0x18] sm:$0xff]  ;;  %v515_v40 = vld [vmem:[%s1460_s8 + $0x20] sm:$0xff]  ;;  %v516_v41 = vld [vmem:[%s1460_s8 + $0x28] sm:$0xff] }
  0x29   :  { %v785_v42 = vld [vmem:[%s1461_s9] sm:$0xff]  ;;  %v786_v43 = vld [vmem:[%s1461_s9 + $0x8] sm:$0xff]  ;;  %v787_v44 = vld [vmem:[%s1461_s9 + $0x10] sm:$0xff] }
  0x2a   :  { %215 = vperm.xlu1 %1073, %v203_v23   ;;  %v788_v45 = vld [vmem:[%s1461_s9 + $0x18] sm:$0xff]  ;;  %v789_v46 = vld [vmem:[%s1461_s9 + $0x20] sm:$0xff]  ;;  %v790_v47 = vld [vmem:[%s1461_s9 + $0x28] sm:$0xff] }
  0x2b   :  { %v791_v48 = vld [vmem:[%s1461_s9 + $0x30] sm:$0xff]  ;;  %v792_v49 = vld [vmem:[%s1461_s9 + $0x38] sm:$0xff]  ;;  %v793_v51 = vld [vmem:[%s1461_s9 + $0x40] sm:$0xff] }
  0x2c   :  { %68 = vxpose.xlu0.b32.cont [11/16] (narrow) %v52_v22, 32  ;;  %v794_v53 = vld [vmem:[%s1461_s9 + $0x48] sm:$0xff]  ;;  %v795_v55 = vld [vmem:[%s1461_s9 + $0x50] sm:$0xff]  ;;  %v796_v58 = vld [vmem:[%s1461_s9 + $0x58] sm:$0xff] }
  0x2d   :  { %v797_v61 = vld [vmem:[%s1461_s9 + $0x60] sm:$0xff]  ;;  %v1076_v62 = vld [vmem:[%s1453_s1 + $0x8] sm:$0xff]   ;;  %v800_v0 = vld [vmem:[%s1461_s9 + $0x78] sm:$0xff] }
  0x2e   :  { %377 = vperm.xlu1 %1073, %v343_v25   ;;  %v798_v63 = vld [vmem:[%s1461_s9 + $0x68] sm:$0xff]  ;;  %v1077_v20 = vld [vmem:[%s1455_s3] sm:$0xff]   ;;  %v1079_v22 = vld [vmem:[%s1455_s3 + $0x10] sm:$0xff]  }
  0x2f   :  { %v1078_v21 = vld [vmem:[%s1455_s3 + $0x8] sm:$0xff]   ;;  %v1080_v23 = vld [vmem:[%s1457_s5] sm:$0xff]   ;;  %v517_v25 = vld [vmem:[%s1460_s8 + $0x30] sm:$0xff] }
  0x30   :  { %69 = vxpose.xlu0.b32.cont [12/16] (narrow) %v53_v24, 32  ;;  %v337_v24 = vld [vmem:[%s1458_s6] sm:$0xff] }
  0x32   :  { %382 = vperm.xlu1 %1073, %v344_v27   ;;  %v519_v27 = vld [vmem:[%s1460_s8 + $0x40] sm:$0xff] }
  0x34   :  { %70 = vxpose.xlu0.b32.cont [13/16] (narrow) %v54_v26, 32  ;;  %v518_v26 = vld [vmem:[%s1460_s8 + $0x38] sm:$0xff] }
  0x36   :  { %367 = vperm.xlu1 %1073, %v341_v29   ;;  %v521_v29 = vld [vmem:[%s1460_s8 + $0x50] sm:$0xff] }
  0x38   :  { %71 = vxpose.xlu0.b32.cont [14/16] (narrow) %v55_v28, 32  ;;  %v520_v28 = vld [vmem:[%s1460_s8 + $0x48] sm:$0xff] }
  0x3a   :  { %372 = vperm.xlu1 %1073, %v342_v31   ;;  %v523_v31 = vld [vmem:[%s1460_s8 + $0x60] sm:$0xff] }
  0x3c   :  { %72 = vxpose.xlu0.b32.cont [15/16] (narrow) %v56_v30, 32  ;;  %v522_v30 = vld [vmem:[%s1460_s8 + $0x58] sm:$0xff] }
  0x3e   :  { %357 = vperm.xlu1 %1073, %v339_v33   ;;  %v525_v33 = vld [vmem:[%s1460_s8 + $0x70] sm:$0xff] }
  0x40   :  { %73 = vxpose.xlu0.b32.end [16/16] (narrow) %v57_v32, 32  ;;  %v524_v32 = vld [vmem:[%s1460_s8 + $0x68] sm:$0xff] }
  0x42   :  { %362 = vperm.xlu1 %1073, %v340_v34   ;;  %v526_v34 = vld [vmem:[%s1460_s8 + $0x78] sm:$0xff] }
  0x46   :  { %352 = vperm.xlu1 %1073, %v338_v35   ;;  %v799_v35 = vld [vmem:[%s1461_s9 + $0x70] sm:$0xff] }
  0x4a   :  { %529 = vperm.xlu1 %1073, %v511_v36   ;;  %v918_v36 = vld [vmem:[#allocation2] sm:$0x1] }
  0x4e   :  { %534 = vperm.xlu1 %1073, %v512_v37  }
  0x52   :  { %539 = vperm.xlu1 %1073, %v513_v38  }
  0x56   :  { %544 = vperm.xlu1 %1073, %v514_v39  }
  0x5a   :  { %549 = vperm.xlu1 %1073, %v515_v40  }
  0x5e   :  { %554 = vperm.xlu1 %1073, %v516_v41  }
  0x62   :  { %803 = vperm.xlu1 %1073, %v785_v42  }
  0x66   :  { %808 = vperm.xlu1 %1073, %v786_v43  }
  0x69   :  { %1074 = vset.pattern.permute.xlu0 %v1114_v2 }
  0x6a   :  { %813 = vperm.xlu1 %1073, %v787_v44   ;;  %347 = vperm.xlu0 %1074, %v337_v24  }
  0x6e   :  { %818 = vperm.xlu1 %1073, %v788_v45   ;;  %559 = vperm.xlu0 %1074, %v517_v25  }
  0x72   :  { %823 = vperm.xlu1 %1073, %v789_v46   ;;  %564 = vperm.xlu0 %1074, %v518_v26  }
  0x76   :  { %828 = vperm.xlu1 %1073, %v790_v47   ;;  %569 = vperm.xlu0 %1074, %v519_v27  }
  0x7a   :  { %833 = vperm.xlu1 %1073, %v791_v48   ;;  %574 = vperm.xlu0 %1074, %v520_v28  }
  0x7e   :  { %838 = vperm.xlu1 %1073, %v792_v49   ;;  %579 = vperm.xlu0 %1074, %v521_v29  }
  0x80   :  { %v74_v50 = vpop.trf.xlu0  ;;  %v113_v2 = vpop.permute.xlu1 %112 }
  0x82   :  { %843 = vperm.xlu1 %1073, %v793_v51   ;;  %584 = vperm.xlu0 %1074, %v522_v30  }
  0x84   :  { %v75_v52 = vpop.trf.xlu0  ;;  %v118_v3 = vpop.permute.xlu1 %117 }
  0x85   :  { %v94_v59 = vpack.c.bf16 %v75_v52, %v74_v50 }
  0x86   :  { %848 = vperm.xlu1 %1073, %v794_v53   ;;  %589 = vperm.xlu0 %1074, %v523_v31  }
  0x88   :  { %v76_v54 = vpop.trf.xlu0  ;;  %v103_v4 = vpop.permute.xlu1 %102 }
  0x8a   :  { %853 = vperm.xlu1 %1073, %v795_v55   ;;  %594 = vperm.xlu0 %1074, %v524_v32  }
  0x8c   :  { %v77_v56 = vpop.trf.xlu0  ;;  %v108_v10 = vpop.permute.xlu1 %107 }
  0x8d   :  { %v95_v57 = vpack.c.bf16 %v77_v56, %v76_v54 }
  0x8e   :  { %858 = vperm.xlu1 %1073, %v796_v58   ;;  %599 = vperm.xlu0 %1074, %v525_v33  }
  0x8f   :  { %1068 = vmatprep.subr.msk.bf16.mxu0 %vm137_vm1, %v95_v57  ;;  %v139_v60 = vsel %vm137_vm1, %v95_v57, 0 }
  0x90   :  { %1007 = vmatpush3.bf16.msra.mxu0 %v139_v60  ;;  %v231_v37 = vpop.permute.xlu1 %230 }
  0x91   :  { %1008 = vmatprep.subr.bf16.mxu0 %v94_v59 }
  0x92   :  { %863 = vperm.xlu1 %1073, %v797_v61   ;;  %604 = vperm.xlu0 %1074, %v526_v34  }
  0x94   :  { %1009 = vmatpush3.bf16.msra.mxu0 %v94_v59  ;;  %v236_v38 = vpop.permute.xlu1 %235 }
  0x95   :  { %1014 = vmatprep.subr.bf16.mxu0 %v1115_v1 }
  0x96   :  { %868 = vperm.xlu1 %1073, %v798_v63   ;;  %873 = vperm.xlu0 %1074, %v799_v35  }
  0x97   :  { %1011 = vmatmul.mubr.msk.bf16.vlgmr.msra.gmra.mxu0 %vm130_vm0, %v1076_v62 }
  0x98   :  { %1018 = vmatprep.mubr.msk.bf16.mxu0 %vm1116_vm2, %v1115_v1  ;;  %v221_v41 = vpop.permute.xlu1 %220 }
  0x9a   :  { %878 = vperm.xlu1 %1073, %v800_v0   ;;  %921 = vperm.xlu0 %1074, %v918_v36  }
  0x9d   :  { %v226_v45 = vpop.permute.xlu1 %225 }
  0xa1   :  { %v211_v49 = vpop.permute.xlu1 %210 }
  0xa5   :  { %v216_v57 = vpop.permute.xlu1 %215 }
 0x157   :  { %v1012_v5 = vpop.f32.mrf.mxu0 }
 0x158   :  { %v184_v7 = vadd.f32 %v1012_v5, %v113_v2 }
 0x159   :  { %v175_v6 = vpop.f32.mrf.mxu0 }
 0x15a   :  { %v192_v12 = vmax.f32 %v184_v7, 0.0  ;;  %v176_v13 = vadd.f32 %v175_v6, %v103_v4  ;;  %v1081_v6 = vld [vmem:[%s1457_s5 + $0x8] sm:$0xff]   ;;  %v1082_v7 = vld [vmem:[%s1457_s5 + $0x10] sm:$0xff]  }
 0x15b   :  { %v1013_v8 = vpop.f32.mrf.mxu0 }
 0x15c   :  { %v187_v9 = vadd.f32 %v1013_v8, %v118_v3  ;;  %v190_v18 = vmax.f32 %v176_v13, 0.0  ;;  %v1083_v8 = vld [vmem:[%s1457_s5 + $0x18] sm:$0xff]  }
 0x15d   :  { %v178_v11 = vpop.f32.mrf.mxu0 }
 0x15e   :  { %v193_v14 = vmax.f32 %v187_v9, 0.0  ;;  %v179_v15 = vadd.f32 %v178_v11, %v108_v10  ;;  %v1084_v9 = vld [vmem:[%s1459_s7] sm:$0xff]   ;;  %v378_v10 = vpop.permute.xlu1 %377 }
 0x15f   :  { %1052 = vmatprep.mubr.msk.bf16.mxu1 %vm647_vm5, %v1084_v9 }
 0x160   :  { %v201_v16 = vpack.c.bf16 %v193_v14, %v192_v12  ;;  %v191_v17 = vmax.f32 %v179_v15, 0.0 }
 0x162   :  { %1015 = vmatpush3.bf16.msra.mxu0 %v201_v16  ;;  %v200_v19 = vpack.c.bf16 %v191_v17, %v190_v18  ;;  %v383_v11 = vpop.permute.xlu1 %382 }
 0x163   :  { %1016 = vmatprep.subr.bf16.mxu0 %v1115_v1 }
 0x166   :  { %1017 = vmatpush3.bf16.msra.mxu0 %v200_v19  ;;  %v368_v12 = vpop.permute.xlu1 %367 }
 0x169   :  { %1019 = vmatmul.mubr.msk.bf16.vlgmr.msra.gmra.mxu0 %vm253_vm3, %v1077_v20 }
 0x16a   :  { %1022 = vmatprep.mubr.msk.bf16.mxu0 %vm1116_vm2, %v1115_v1  ;;  %v373_v13 = vpop.permute.xlu1 %372 }
 0x16e   :  { %v358_v17 = vpop.permute.xlu1 %357 }
 0x171   :  { %1023 = vmatmul.mubr.msk.bf16.gmra.mxu0 %vm253_vm3, %v1078_v21 }
 0x172   :  { %1026 = vmatprep.mubr.msk.bf16.mxu0 %vm1116_vm2, %v1115_v1 }
 0x179   :  { %1027 = vmatmul.mubr.msk.bf16.gmra.mxu0 %vm253_vm3, %v1079_v22  ;;  %v363_v22 = vpop.permute.xlu1 %362 }
 0x17a   :  { %1036 = vmatprep.mubr.msk.bf16.mxu0 %vm405_vm4, %v1080_v23 }
 0x17d   :  { %v353_v35 = vpop.permute.xlu1 %352 }
 0x229   :  { %v297_v39 = vpop.f32.mrf.mxu0 }
 0x22a   :  { %v298_v63 = vadd.f32 %v297_v39, %v211_v49  ;;  %v348_v39 = vpop.permute.xlu0 %347  ;;  %v1088_v49 = vld [vmem:[%s1459_s7 + $0x20] sm:$0xff]  }
 0x22b   :  { %v1020_v40 = vpop.f32.mrf.mxu0 }
 0x22c   :  { %v320_v4 = vmax.f32 %v298_v63, 0.0 }
 0x22d   :  { %v300_v42 = vpop.f32.mrf.mxu0 }
 0x22e   :  { %v301_v59 = vadd.f32 %v300_v42, %v216_v57  ;;  %v560_v63 = vpop.permute.xlu0 %559 }
 0x22f   :  { %v1021_v43 = vpop.f32.mrf.mxu0 }
 0x230   :  { %v321_v2 = vmax.f32 %v301_v59, 0.0 }
 0x231   :  { %v305_v44 = vpop.f32.mrf.mxu0 }
 0x232   :  { %v306_v55 = vadd.f32 %v305_v44, %v221_v41  ;;  %v334_v5 = vpack.c.bf16 %v321_v2, %v320_v4 }
 0x233   :  { %v1024_v46 = vpop.f32.mrf.mxu0 }
 0x234   :  { %v322_v0 = vmax.f32 %v306_v55, 0.0  ;;  %v1085_v46 = vld [vmem:[%s1459_s7 + $0x8] sm:$0xff]  }
 0x235   :  { %v308_v47 = vpop.f32.mrf.mxu0 }
 0x236   :  { %v309_v52 = vadd.f32 %v308_v47, %v226_v45  ;;  %v1086_v47 = vld [vmem:[%s1459_s7 + $0x10] sm:$0xff]  }
 0x237   :  { %v1025_v48 = vpop.f32.mrf.mxu0 }
 0x238   :  { %v323_v60 = vmax.f32 %v309_v52, 0.0  ;;  %v1087_v48 = vld [vmem:[%s1459_s7 + $0x18] sm:$0xff]  }
 0x239   :  { %v313_v50 = vpop.f32.mrf.mxu0  ;;  %v1091_v52 = vld [vmem:[%s1459_s7 + $0x38] sm:$0xff]  }
 0x23a   :  { %v314_v53 = vadd.f32 %v313_v50, %v231_v37  ;;  %v335_v3 = vpack.c.bf16 %v323_v60, %v322_v0  ;;  %v1089_v50 = vld [vmem:[%s1459_s7 + $0x28] sm:$0xff]  }
 0x23b   :  { %v1028_v51 = vpop.f32.mrf.mxu0 }
 0x23c   :  { %v324_v61 = vmax.f32 %v314_v53, 0.0  ;;  %v1090_v51 = vld [vmem:[%s1459_s7 + $0x30] sm:$0xff]   ;;  %v530_v53 = vpop.permute.xlu1 %529  ;;  %s1117_s7 = smov [#allocation3]  }
 0x23d   :  { %v316_v54 = vpop.f32.mrf.mxu0  ;;  %s936_s21 = sshll.u32 %s1117_s7, 4  ;;  %s937_s21 = int_to_ptr.vmem [resolvable:$true] %s936_s21 }
 0x23e   :  { %v317_v56 = vadd.f32 %v316_v54, %v236_v38  ;;  %s1092_s1 = scalar_lea.vmem %s937_s21, 16  ;;  %s1096_s22 = scalar_lea.vmem %s937_s21, 32 }
 0x23f   :  { %v1029_v58 = vpop.f32.mrf.mxu0  ;;  %p1093_p0 = scmp.ne.s32.totalorder %s937_s21, %s1092_s1  ;;  %p1097_p1 = scmp.lt.s32.totalorder %s937_s21, %s937_s21 }
 0x240   :  { %v325_v62 = vmax.f32 %v317_v56, 0.0  ;;  %v535_v54 = vpop.permute.xlu1 %534  ;;  %p1098_p2 = scmp.lt.s32.totalorder %s1096_s22, %s1092_s1 }
 0x242   :  { %v336_v1 = vpack.c.bf16 %v325_v62, %v324_v61  ;;  %p1099_p3 = por %p1098_p2, %p1097_p1 }
 0x244   :  { %1030 = vmatprep.subr.bf16.mxu0 %v336_v1  ;;  %v540_v55 = vpop.permute.xlu1 %539  ;;  %p1100_p4 = pnand %p1099_p3, %p1093_p0 }
 0x245   :  { %1031 = vmatpush3.bf16.msra.mxu0 %v336_v1  ;;  %v565_v1 = vpop.permute.xlu0 %564 }
 0x246   :  { %1032 = vmatprep.subr.bf16.mxu0 %v335_v3 }
 0x248   :  { %v545_v56 = vpop.permute.xlu1 %544 }
 0x249   :  { %1033 = vmatpush3.bf16.msra.mxu0 %v335_v3  ;;  %v570_v3 = vpop.permute.xlu0 %569 }
 0x24a   :  { %1034 = vmatprep.subr.bf16.mxu0 %v334_v5 }
 0x24c   :  { %v550_v57 = vpop.permute.xlu1 %549 }
 0x24d   :  { %1035 = vmatpush3.bf16.msra.mxu0 %v334_v5  ;;  %v575_v5 = vpop.permute.xlu0 %574 }
 0x250   :  { %1037 = vmatmul.mubr.msk.bf16.vlgmr.msra.gmra.mxu0 %vm405_vm4, %v1081_v6  ;;  %v555_v58 = vpop.permute.xlu1 %554 }
 0x251   :  { %1040 = vmatprep.mubr.msk.bf16.mxu0 %vm405_vm4, %v1082_v7  ;;  %v580_v7 = vpop.permute.xlu0 %579 }
 0x254   :  { %v804_v59 = vpop.permute.xlu1 %803 }
 0x258   :  { %1041 = vmatmul.mubr.msk.bf16.gmra.mxu0 %vm405_vm4, %v1083_v8  ;;  %v809_v60 = vpop.permute.xlu1 %808 }
 0x25c   :  { %v814_v61 = vpop.permute.xlu1 %813 }
 0x260   :  { %v819_v62 = vpop.permute.xlu1 %818 }
 0x264   :  { %v824_v0 = vpop.permute.xlu1 %823 }
 0x268   :  { %v829_v2 = vpop.permute.xlu1 %828 }
 0x26c   :  { %v834_v4 = vpop.permute.xlu1 %833 }
 0x270   :  { %v839_v6 = vpop.permute.xlu1 %838 }
 0x274   :  { %v844_v9 = vpop.permute.xlu1 %843 }
 0x310   :  { %v1038_v14 = vpop.f32.mrf.mxu0 }
 0x311   :  { %v461_v31 = vadd.f32 %v1038_v14, %v358_v17  ;;  %v585_v14 = vpop.permute.xlu0 %584 }
 0x312   :  { %v452_v15 = vpop.f32.mrf.mxu0 }
 0x313   :  { %v485_v40 = vmax.f32 %v461_v31, 0.0  ;;  %v453_v41 = vadd.f32 %v452_v15, %v348_v39 }
 0x314   :  { %v1039_v16 = vpop.f32.mrf.mxu0 }
 0x315   :  { %v464_v27 = vadd.f32 %v1039_v16, %v363_v22  ;;  %v483_v44 = vmax.f32 %v453_v41, 0.0 }
 0x316   :  { %v455_v18 = vpop.f32.mrf.mxu0 }
 0x317   :  { %v486_v36 = vmax.f32 %v464_v27, 0.0  ;;  %v456_v37 = vadd.f32 %v455_v18, %v353_v35 }
 0x318   :  { %v1042_v19 = vpop.f32.mrf.mxu0 }
 0x319   :  { %v477_v21 = vadd.f32 %v1042_v19, %v378_v10  ;;  %v508_v42 = vpack.c.bf16 %v486_v36, %v485_v40  ;;  %v484_v43 = vmax.f32 %v456_v37, 0.0  ;;  %v849_v19 = vpop.permute.xlu1 %848 }
 0x31a   :  { %v468_v20 = vpop.f32.mrf.mxu0 }
 0x31b   :  { %v469_v24 = vadd.f32 %v468_v20, %v368_v12  ;;  %v489_v28 = vmax.f32 %v477_v21, 0.0  ;;  %v507_v45 = vpack.c.bf16 %v484_v43, %v483_v44 }
 0x31c   :  { %v1043_v23 = vpop.f32.mrf.mxu0 }
 0x31d   :  { %v480_v25 = vadd.f32 %v1043_v23, %v383_v11  ;;  %v487_v32 = vmax.f32 %v469_v24, 0.0 }
 0x31e   :  { %v471_v26 = vpop.f32.mrf.mxu0 }
 0x31f   :  { %v490_v29 = vmax.f32 %v480_v25, 0.0  ;;  %v472_v30 = vadd.f32 %v471_v26, %v373_v13 }
 0x321   :  { %v488_v33 = vmax.f32 %v472_v30, 0.0  ;;  %v510_v34 = vpack.c.bf16 %v490_v29, %v489_v28  ;;  %v590_v28 = vpop.permute.xlu0 %589 }
 0x323   :  { %v509_v38 = vpack.c.bf16 %v488_v33, %v487_v32  ;;  %1044 = vmatprep.subr.bf16.mxu1 %v510_v34 }
 0x324   :  { %1045 = vmatpush3.bf16.msra.mxu1 %v510_v34  ;;  %v854_v34 = vpop.permute.xlu1 %853 }
 0x325   :  { %1046 = vmatprep.subr.bf16.mxu1 %v509_v38 }
 0x328   :  { %1047 = vmatpush3.bf16.msra.mxu1 %v509_v38 }
 0x329   :  { %1048 = vmatprep.subr.bf16.mxu1 %v508_v42 }
 0x32c   :  { %1049 = vmatpush3.bf16.msra.mxu1 %v508_v42 }
 0x32d   :  { %1050 = vmatprep.subr.bf16.mxu1 %v507_v45 }
 0x330   :  { %1051 = vmatpush3.bf16.msra.mxu1 %v507_v45  ;;  %v595_v45 = vpop.permute.xlu0 %594 }
 0x333   :  { %1053 = vmatmul.mubr.msk.bf16.vlgmr.msra.gmra.mxu1 %vm647_vm5, %v1085_v46 }
 0x334   :  { %1056 = vmatprep.mubr.msk.bf16.mxu1 %vm647_vm5, %v1086_v47 }
 0x33b   :  { %1057 = vmatmul.mubr.msk.bf16.gmra.mxu1 %vm647_vm5, %v1087_v48 }
 0x33c   :  { %1060 = vmatprep.mubr.msk.bf16.mxu1 %vm647_vm5, %v1088_v49 }
 0x343   :  { %1061 = vmatmul.mubr.msk.bf16.gmra.mxu1 %vm647_vm5, %v1089_v50 }
 0x344   :  { %1064 = vmatprep.mubr.msk.bf16.mxu1 %vm647_vm5, %v1090_v51  ;;  %v859_v51 = vpop.permute.xlu1 %858 }
 0x34b   :  { %1065 = vmatmul.mubr.msk.bf16.gmra.mxu1 %vm647_vm5, %v1091_v52 }
 0x3f3   :  { %v1054_v8 = vpop.f32.mrf.mxu1 }
 0x3f4   :  { %v715_v13 = vadd.f32 %v1054_v8, %v540_v55 }
 0x3f5   :  { %v706_v10 = vpop.f32.mrf.mxu1 }
 0x3f6   :  { %v707_v11 = vadd.f32 %v706_v10, %v530_v53  ;;  %v771_v21 = vmax.f32 %v715_v13, 0.0 }
 0x3f7   :  { %v1055_v12 = vpop.f32.mrf.mxu1 }
 0x3f8   :  { %v769_v16 = vmax.f32 %v707_v11, 0.0  ;;  %v718_v17 = vadd.f32 %v1055_v12, %v545_v56  ;;  %v883_v30 = vmul.f32 %v814_v61, %v771_v21  ;;  %v864_v11 = vpop.permute.xlu1 %863 }
 0x3f9   :  { %v709_v15 = vpop.f32.mrf.mxu1 }
 0x3fa   :  { %v710_v18 = vadd.f32 %v709_v15, %v535_v54  ;;  %v881_v24 = vmul.f32 %v804_v59, %v769_v16  ;;  %v772_v25 = vmax.f32 %v718_v17, 0.0 }
 0x3fb   :  { %v1058_v20 = vpop.f32.mrf.mxu1 }
 0x3fc   :  { %v770_v22 = vmax.f32 %v710_v18, 0.0  ;;  %v731_v32 = vadd.f32 %v1058_v20, %v560_v63  ;;  %v884_v36 = vmul.f32 %v819_v62, %v772_v25  ;;  %v600_v62 = vpop.permute.xlu0 %599 }
 0x3fd   :  { %v722_v23 = vpop.f32.mrf.mxu1 }
 0x3fe   :  { %v882_v26 = vmul.f32 %v809_v60, %v770_v22  ;;  %v723_v27 = vadd.f32 %v722_v23, %v550_v57  ;;  %v775_v41 = vmax.f32 %v731_v32, 0.0 }
 0x3ff   :  { %v1059_v29 = vpop.f32.mrf.mxu1 }
 0x400   :  { %v897_v31 = vadd.f32 %v882_v26, %v881_v24  ;;  %v773_v33 = vmax.f32 %v723_v27, 0.0  ;;  %v734_v38 = vadd.f32 %v1059_v29, %v565_v1  ;;  %v887_v53 = vmul.f32 %v834_v4, %v775_v41  ;;  %v605_v18 = vpop.permute.xlu0 %604 }
 0x401   :  { %v725_v35 = vpop.f32.mrf.mxu1 }
 0x402   :  { %v898_v37 = vadd.f32 %v897_v31, %v883_v30  ;;  %v726_v39 = vadd.f32 %v725_v35, %v555_v58  ;;  %v885_v42 = vmul.f32 %v824_v0, %v773_v33  ;;  %v776_v48 = vmax.f32 %v734_v38, 0.0 }
 0x403   :  { %v1062_v40 = vpop.f32.mrf.mxu1  ;;  %v924_v35 = vlaneseq }
 0x404   :  { %v899_v43 = vadd.f32 %v898_v37, %v884_v36  ;;  %v774_v44 = vmax.f32 %v726_v39, 0.0  ;;  %v747_v55 = vadd.f32 %v1062_v40, %v580_v7  ;;  %v888_v59 = vmul.f32 %v839_v6, %v776_v48 }
 0x405   :  { %v738_v46 = vpop.f32.mrf.mxu1  ;;  %v925_v38 = vshrl.u32 %v924_v35, 7 }
 0x406   :  { %v900_v47 = vadd.f32 %v899_v43, %v885_v42  ;;  %v886_v49 = vmul.f32 %v829_v2, %v774_v44  ;;  %v739_v50 = vadd.f32 %v738_v46, %v570_v3  ;;  %v779_v0 = vmax.f32 %v747_v55, 0.0 }
 0x407   :  { %v1063_v52 = vpop.f32.mrf.mxu1  ;;  %v926_v41 = vsub.s32 0, %v925_v38 }
 0x408   :  { %v901_v54 = vadd.f32 %v900_v47, %v886_v49  ;;  %v777_v56 = vmax.f32 %v739_v50, 0.0  ;;  %v750_v60 = vadd.f32 %v1063_v52, %v585_v14  ;;  %v891_v7 = vmul.f32 %v854_v34, %v779_v0 }
 0x409   :  { %v741_v57 = vpop.f32.mrf.mxu1 }
 0x40a   :  { %v902_v58 = vadd.f32 %v901_v54, %v887_v53  ;;  %v742_v61 = vadd.f32 %v741_v57, %v575_v5  ;;  %v889_v1 = vmul.f32 %v844_v9, %v777_v56  ;;  %v780_v12 = vmax.f32 %v750_v60, 0.0  ;;  %v869_v9 = vpop.permute.xlu1 %868 }
 0x40b   :  { %v1066_v63 = vpop.f32.mrf.mxu1 }
 0x40c   :  { %v903_v8 = vadd.f32 %v902_v58, %v888_v59  ;;  %v778_v10 = vmax.f32 %v742_v61, 0.0  ;;  %v763_v17 = vadd.f32 %v1066_v63, %v600_v62  ;;  %v892_v5 = vmul.f32 %v859_v51, %v780_v12 }
 0x40d   :  { %v754_v2 = vpop.f32.mrf.mxu1 }
 0x40e   :  { %v904_v3 = vadd.f32 %v903_v8, %v889_v1  ;;  %v890_v13 = vmul.f32 %v849_v19, %v778_v10  ;;  %v755_v4 = vadd.f32 %v754_v2, %v590_v28  ;;  %v783_v23 = vmax.f32 %v763_v17, 0.0  ;;  %v874_v28 = vpop.permute.xlu0 %873  ;;  %v879_v32 = vpop.permute.xlu1 %878 }
 0x40f   :  { %v1067_v15 = vpop.f32.mrf.mxu1 }
 0x410   :  { %v905_v16 = vadd.f32 %v904_v3, %v890_v13  ;;  %v781_v6 = vmax.f32 %v755_v4, 0.0  ;;  %v766_v21 = vadd.f32 %v1067_v15, %v605_v18  ;;  %v895_v30 = vmul.f32 %v874_v28, %v783_v23 }
 0x411   :  { %v757_v14 = vpop.f32.mrf.mxu1 }
 0x412   :  { %v906_v20 = vadd.f32 %v905_v16, %v891_v7  ;;  %v758_v22 = vadd.f32 %v757_v14, %v595_v45  ;;  %v893_v24 = vmul.f32 %v864_v11, %v781_v6  ;;  %v784_v29 = vmax.f32 %v766_v21, 0.0  ;;  %v922_v43 = vpop.permute.xlu0 %921 }
 0x413   :  { %v927_v45 = vrot.slane %v922_v43, %v926_v41 }
 0x414   :  { %v907_v25 = vadd.f32 %v906_v20, %v892_v5  ;;  %v782_v26 = vmax.f32 %v758_v22, 0.0  ;;  %v896_v33 = vmul.f32 %v879_v32, %v784_v29 }
 0x416   :  { %v908_v27 = vadd.f32 %v907_v25, %v893_v24  ;;  %v894_v19 = vmul.f32 %v869_v9, %v782_v26 }
 0x418   :  { %v909_v31 = vadd.f32 %v908_v27, %v894_v19 }
 0x41a   :  { %v910_v34 = vadd.f32 %v909_v31, %v895_v30 }
 0x41c   :  { %v911_v36 = vadd.f32 %v910_v34, %v896_v33 }
 0x41e   :  { %v912_v37 = vrot.slane %v911_v36, 4 }
 0x420   :  { %v913_v39 = vadd.f32 %v912_v37, %v911_v36 }
 0x422   :  { %v914_v40 = vrot.slane %v913_v39, 2 }
 0x424   :  { %v915_v42 = vadd.f32 %v914_v40, %v913_v39 }
 0x426   :  { %v916_v44 = vrot.slane %v915_v42, 1 }
 0x428   :  { %v917_v46 = vadd.f32 %v916_v44, %v915_v42 }
 0x42a   :  { %v928_v47 = vadd.f32 %v927_v45, %v917_v46 }
 0x42c   :  { %929 = vst [vmem:[#allocation3] sm:$0x1] %v928_v47 }
 0x42d   :  { %1103 = shalt.err (!%p1100_p4)
}
 0x42e   :  { %939 = dma.vmem_to_hbm [thread:$0]  %s937_s21, 16, %s1463_s11, [#allocation4]  }
 0x42f   :  { %1112 = dma.done.wait [#allocation4], 16  }
 0x430   :  { %1113 = vsyncadd [#allocation4], 4294967280 }
 0x431   :  { %943 = vsyncpa [#allocation4], 1 }

</bundles_post_ra>
